<compile_context>
chip_gen: v7x
topology: tpu7x:2x2x1
jax: 0.10.0
libtpu: 0.0.40
codegen_flags: <defaults>
</compile_context>

<pallas_src>
import functools

import jax
import jax.numpy as jnp
from jax import lax
from jax.experimental import pallas as pl
from jax.experimental.pallas import tpu as pltpu


def _round_up(x, m):
    return ((x + m - 1) // m) * m


# ----------------------------- Pallas kernels ------------------------------
# Grid: (M tiles [parallel], K tiles [arbitrary / reduction]).

def _conv_bn_relu_kernel(patches_ref, w_ref, shift_ref, o_ref, acc_ref):
    k = pl.program_id(1)

    @pl.when(k == 0)
    def _():
        acc_ref[...] = jnp.zeros_like(acc_ref)

    acc_ref[...] += jnp.dot(patches_ref[...], w_ref[...],
                            preferred_element_type=jnp.float32)

    @pl.when(k == pl.num_programs(1) - 1)
    def _():
        out = acc_ref[...] + shift_ref[...]
        o_ref[...] = jnp.maximum(out, 0.0).astype(o_ref.dtype)


def _conv_bn_res_relu_kernel(patches_ref, w_ref, shift_ref, res_ref,
                             o_ref, acc_ref):
    k = pl.program_id(1)

    @pl.when(k == 0)
    def _():
        acc_ref[...] = jnp.zeros_like(acc_ref)

    acc_ref[...] += jnp.dot(patches_ref[...], w_ref[...],
                            preferred_element_type=jnp.float32)

    @pl.when(k == pl.num_programs(1) - 1)
    def _():
        out = acc_ref[...] + shift_ref[...] + res_ref[...]
        o_ref[...] = jnp.maximum(out, 0.0).astype(o_ref.dtype)


# ------------------------------ JAX wrapper ---------------------------------

def _im2col(x, kh, kw, stride, padding):
    """x: [B, Cin, H, W] -> patches [B*Ho*Wo, Cin*kh*kw] (feature order ci,kh,kw)."""
    B, Cin, H, W = x.shape
    Ho = (H + 2 * padding - kh) // stride + 1
    Wo = (W + 2 * padding - kw) // stride + 1
    xp = jnp.pad(x, ((0, 0), (0, 0), (padding, padding), (padding, padding)))
    cols = []
    for i in range(kh):
        for j in range(kw):
            cols.append(xp[:, :, i:i + stride * Ho:stride,
                              j:j + stride * Wo:stride])       # [B, Cin, Ho, Wo]
    p = jnp.stack(cols, axis=2)                  # [B, Cin, kh*kw, Ho, Wo]
    p = jnp.transpose(p, (0, 3, 4, 1, 2))        # [B, Ho, Wo, Cin, kh*kw]
    return p.reshape(B * Ho * Wo, Cin * kh * kw), Ho, Wo


def conv2d_block(x, params, *, stride, padding, residual,
                 tm=512, tk=512, compute_dtype=jnp.bfloat16,
                 out_dtype=jnp.float32, eps=1e-5):
    """Forward of the PyTorch Conv2d module (Conv -> BN(eval) -> [+x] -> ReLU)."""
    w = params["weight"]          # [Cout, Cin, KH, KW]
    b = params["bias"]            # [Cout]
    gamma = params["gamma"]
    beta = params["beta"]
    rmean = params["running_mean"]
    rvar = params["running_var"]

    B, Cin, H, W = x.shape
    Cout, _, KH, KW = w.shape

    # im2col; cast to MXU compute dtype first to halve the patch HBM traffic.
    patches, Ho, Wo = _im2col(x.astype(compute_dtype), KH, KW, stride, padding)
    M, K = patches.shape

    # Fold conv bias + BN(eval) into the weight matrix / per-channel shift.
    scale = gamma / jnp.sqrt(rvar + eps)                        # [Cout]
    shift = (b - rmean) * scale + beta                          # [Cout]
    w_mat = (w.reshape(Cout, K).T.astype(jnp.float32)
             * scale[None, :]).astype(compute_dtype)            # [K, Cout]

    # Lane-dense output channels (unmasked vst, full MXU result columns).
    Cout_pad = _round_up(Cout, 128)
    # Contraction tiling: tk must be a multiple of 128.
    tk = min(tk, _round_up(K, 128))
    K_pad = _round_up(K, tk)

    c_bytes = 2 if compute_dtype == jnp.bfloat16 else 4
    o_bytes = 2 if out_dtype == jnp.bfloat16 else 4

    # M tiling: multiple of 8, clamped by a VMEM budget (v7x: 64 MiB physical).
    tm = min(tm, _round_up(M, 8))

    def vmem_bytes(tm_):
        est = 2 * tm_ * tk * c_bytes           # patches (double-buffered)
        est += 2 * tk * Cout_pad * c_bytes     # weight strip
        est += 2 * tm_ * Cout_pad * o_bytes    # output tile
        est += 2 * Cout_pad * 4                # shift row
        est += tm_ * Cout_pad * 4              # f32 accumulator scratch
        if residual:
            est += 2 * tm_ * Cout_pad * 4      # residual tile (f32)
        return est

    VMEM_BUDGET = 48 * 1024 * 1024
    while vmem_bytes(tm) > VMEM_BUDGET and tm > 8:
        tm = max(8, (tm // 2 + 7) // 8 * 8)
    M_pad = _round_up(M, tm)

    if (M_pad, K_pad) != (M, K):
        patches = jnp.pad(patches, ((0, M_pad - M), (0, K_pad - K)))
    if (K_pad, Cout_pad) != (K, Cout):
        w_mat = jnp.pad(w_mat, ((0, K_pad - K), (0, Cout_pad - Cout)))
    shift_row = jnp.pad(shift.astype(jnp.float32),
                        (0, Cout_pad - Cout)).reshape(1, Cout_pad)

    grid = (M_pad // tm, K_pad // tk)
    in_specs = [
        pl.BlockSpec((tm, tk), lambda i, k: (i, k)),           # patches tile
        pl.BlockSpec((tk, Cout_pad), lambda i, k: (k, 0)),     # weight strip
        pl.BlockSpec((1, Cout_pad), lambda i, k: (0, 0)),      # shift (resident)
    ]
    out_spec = pl.BlockSpec((tm, Cout_pad), lambda i, k: (i, 0))
    out_shape = jax.ShapeDtypeStruct((M_pad, Cout_pad), out_dtype)
    scratch = [pltpu.VMEM((tm, Cout_pad), jnp.float32)]

    operands = [patches, w_mat, shift_row]
    kernel = _conv_bn_relu_kernel
    bytes_accessed = (M_pad * K_pad * c_bytes + K_pad * Cout_pad * c_bytes
                      + Cout_pad * 4 + M_pad * Cout_pad * o_bytes)

    if residual:
        # Residual requires Cin == Cout and preserved spatial dims.
        assert Cin == Cout and Ho == H and Wo == W, "residual shape mismatch"
        res = jnp.transpose(x, (0, 2, 3, 1)).reshape(M, Cout).astype(jnp.float32)
        res = jnp.pad(res, ((0, M_pad - M), (0, Cout_pad - Cout)))
        in_specs.append(pl.BlockSpec((tm, Cout_pad), lambda i, k: (i, 0)))
        operands.append(res)
        bytes_accessed += M_pad * Cout_pad * 4
        kernel = _conv_bn_res_relu_kernel

    cost = pl.CostEstimate(flops=2 * M_pad * K_pad * Cout_pad,
                           transcendentals=0,
                           bytes_accessed=int(bytes_accessed))
    cparams = pltpu.CompilerParams(
        dimension_semantics=("parallel", "arbitrary"),
        vmem_limit_bytes=int(min(64 * 1024 * 1024,
                                 max(32 * 1024 * 1024,
                                     vmem_bytes(tm) + (4 << 20)))))

    out_flat = pl.pallas_call(
        kernel,
        out_shape=out_shape,
        grid=grid,
        in_specs=in_specs,
        out_specs=out_spec,
        scratch_shapes=scratch,
        compiler_params=cparams,
        cost_estimate=cost,
    )(*operands)

    out = out_flat[:M, :Cout].reshape(B, Ho, Wo, Cout)          # drop padding
    return jnp.transpose(out, (0, 3, 1, 2))                     # back to NCHW


# --------------------------- pure-JAX reference ------------------------------

def conv2d_block_ref(x, params, *, stride, padding, residual, eps=1e-5):
    w, b = params["weight"], params["bias"]
    y = lax.conv_general_dilated(
        x, w, window_strides=(stride, stride),
        padding=[(padding, padding), (padding, padding)],
        dimension_numbers=("NCHW", "OIHW", "NCHW"))
    y = y + b[None, :, None, None]
    scale = params["gamma"] / jnp.sqrt(params["running_var"] + eps)
    y = (y - params["running_mean"][None, :, None, None]) * scale[None, :, None, None]
    y = y + params["beta"][None, :, None, None]
    if residual:
        y = y + x
    return jnp.maximum(y, 0.0)


# ---------------------------------- main -------------------------------------

if __name__ == "__main__":
    key = jax.random.PRNGKey(0)

    def make_params(k, cout, cin, ksz):
        ks = jax.random.split(k, 6)
        return {
            "weight": 0.1 * jax.random.normal(ks[0], (cout, cin, ksz, ksz), jnp.float32),
            "bias": 0.1 * jax.random.normal(ks[1], (cout,), jnp.float32),
            "gamma": 1.0 + 0.1 * jax.random.normal(ks[2], (cout,), jnp.float32),
            "beta": 0.1 * jax.random.normal(ks[3], (cout,), jnp.float32),
            "running_mean": 0.1 * jax.random.normal(ks[4], (cout,), jnp.float32),
            "running_var": jnp.abs(1.0 + 0.1 * jax.random.normal(ks[5], (cout,), jnp.float32)),
        }

    # Small configs mirroring real FaceRenderer encoder layers.
    configs = [
        # name,          B, Cin, Cout, k, s, p, residual, H,  W
        ("enc0_7x7_s1",  2, 6,   16,   7, 1, 3, False,    16, 16),
        ("enc1_3x3_s2",  2, 16,  32,   3, 2, 1, False,    16, 16),
        ("enc1_3x3_res", 2, 32,  32,   3, 1, 1, True,     8,  8),
    ]

    last = None
    for name, B, Cin, Cout, ksz, s, p, res, H, W in configs:
        key, kx, kp = jax.random.split(key, 3)
        x = jax.random.normal(kx, (B, Cin, H, W), jnp.float32)
        params = make_params(kp, Cout, Cin, ksz)
        ref = conv2d_block_ref(x, params, stride=s, padding=p, residual=res)

        # Optimized bf16-MXU path (f32 accumulate) — loose tolerance.
        fwd = functools.partial(conv2d_block, stride=s, padding=p, residual=res,
                                compute_dtype=jnp.bfloat16)
        out = jax.block_until_ready(jax.jit(fwd)(x, params))
        assert out.shape == ref.shape, (name, out.shape, ref.shape)
        err = float(jnp.max(jnp.abs(out - ref)))
        assert jnp.allclose(out, ref, atol=6e-2, rtol=5e-2), (name, err)
        last = (name, x, params, ref, s, p, res)

    # Tight-tolerance check of the same kernel with f32 MXU inputs.
    name, x, params, ref, s, p, res = last
    fwd32 = functools.partial(conv2d_block, stride=s, padding=p, residual=res,
                              compute_dtype=jnp.float32)
    out32 = jax.block_until_ready(jax.jit(fwd32)(x, params))
    err32 = float(jnp.max(jnp.abs(out32 - ref)))
    assert jnp.allclose(out32, ref, atol=1e-4, rtol=1e-4), (name, err32)

    print("KERNEL_OK")
</pallas_src>

<mosaic_0001>
module attributes {stable_mosaic.version = 11 : i64} {
  func.func @_conv_bn_relu_kernel(%arg0: i32, %arg1: i32, %arg2: memref<512x384xbf16, #tpu.memory_space<vmem>>, %arg3: memref<384x128xbf16, #tpu.memory_space<vmem>>, %arg4: memref<1x128xf32, #tpu.memory_space<vmem>>, %arg5: memref<512x128xf32, #tpu.memory_space<vmem>>, %arg6: memref<512x128xf32, #tpu.memory_space<vmem>>) attributes {dimension_semantics = [#tpu.dimension_semantics<parallel>, #tpu.dimension_semantics<arbitrary>], iteration_bounds = array<i64: 1, 1>, scalar_prefetch = 0 : i64, scratch_operands = 1 : i64, tpu.core_type = #tpu.core_type<tc>, window_params = [{transform_indices = @transform_0, window_bounds = array<i64: 512, 384>}, {transform_indices = @transform_1, window_bounds = array<i64: 384, 128>}, {pipeline_mode = #tpu.pipeline_mode<synchronous>, transform_indices = @transform_2, window_bounds = array<i64: 1, 128>}, {transform_indices = @transform_3, window_bounds = array<i64: 512, 128>}]} {
    %c0_i32 = arith.constant 0 : i32
    %0 = arith.cmpi eq, %arg1, %c0_i32 : i32
    %1 = arith.extui %0 : i1 to i32
    %c0_i32_0 = arith.constant 0 : i32
    %2 = arith.cmpi ne, %1, %c0_i32_0 : i32
    scf.if %2 {
      %cst_10 = arith.constant 0.000000e+00 : f32
      %12 = vector.broadcast %cst_10 : f32 to vector<512x128xf32>
      %c0_11 = arith.constant 0 : index
      %c0_12 = arith.constant 0 : index
      %13 = vector.load %arg6[%c0_11, %c0_12] : memref<512x128xf32, #tpu.memory_space<vmem>>, vector<512x128xf32>
      tpu.vector_store %arg6[%c0_11, %c0_12], %12 {strides = array<i32>} : memref<512x128xf32, #tpu.memory_space<vmem>>, vector<512x128xf32>,
    } else {
    }
    %c0 = arith.constant 0 : index
    %c0_1 = arith.constant 0 : index
    %3 = vector.load %arg6[%c0, %c0_1] : memref<512x128xf32, #tpu.memory_space<vmem>>, vector<512x128xf32>
    %c0_2 = arith.constant 0 : index
    %c0_3 = arith.constant 0 : index
    %4 = vector.load %arg2[%c0_2, %c0_3] : memref<512x384xbf16, #tpu.memory_space<vmem>>, vector<512x384xbf16>
    %c0_4 = arith.constant 0 : index
    %c0_5 = arith.constant 0 : index
    %5 = vector.load %arg3[%c0_4, %c0_5] : memref<384x128xbf16, #tpu.memory_space<vmem>>, vector<384x128xbf16>
    %cst = arith.constant dense<0.000000e+00> : vector<512x128xf32>
    %6 = tpu.matmul %4, %5, %cst {dimension_numbers = #tpu.dot_dimension_numbers<[1], [0], [0], [1], [0, 0, 1, 1], [], []>} : vector<512x384xbf16>, vector<384x128xbf16>, vector<512x128xf32> -> vector<512x128xf32>
    %7 = arith.addf %3, %6 : vector<512x128xf32>
    %c0_6 = arith.constant 0 : index
    %c0_7 = arith.constant 0 : index
    %8 = vector.load %arg6[%c0_6, %c0_7] : memref<512x128xf32, #tpu.memory_space<vmem>>, vector<512x128xf32>
    tpu.vector_store %arg6[%c0_6, %c0_7], %7 {strides = array<i32>} : memref<512x128xf32, #tpu.memory_space<vmem>>, vector<512x128xf32>,
    %c0_i32_8 = arith.constant 0 : i32
    %9 = arith.cmpi eq, %arg1, %c0_i32_8 : i32
    %10 = arith.extui %9 : i1 to i32
    %c0_i32_9 = arith.constant 0 : i32
    %11 = arith.cmpi ne, %10, %c0_i32_9 : i32
    scf.if %11 {
      %c0_10 = arith.constant 0 : index
      %c0_11 = arith.constant 0 : index
      %12 = vector.load %arg6[%c0_10, %c0_11] : memref<512x128xf32, #tpu.memory_space<vmem>>, vector<512x128xf32>
      %c0_12 = arith.constant 0 : index
      %c0_13 = arith.constant 0 : index
      %13 = vector.load %arg4[%c0_12, %c0_13] : memref<1x128xf32, #tpu.memory_space<vmem>>, vector<1x128xf32>
      %14 = vector.broadcast %13 : vector<1x128xf32> to vector<512x128xf32>
      %15 = arith.addf %12, %14 : vector<512x128xf32>
      %cst_14 = arith.constant 0.000000e+00 : f32
      %16 = vector.broadcast %cst_14 : f32 to vector<512x128xf32>
      %17 = arith.maximumf %15, %16 : vector<512x128xf32>
      %c0_15 = arith.constant 0 : index
      %c0_16 = arith.constant 0 : index
      %18 = vector.load %arg5[%c0_15, %c0_16] : memref<512x128xf32, #tpu.memory_space<vmem>>, vector<512x128xf32>
      tpu.vector_store %arg5[%c0_15, %c0_16], %17 {strides = array<i32>} : memref<512x128xf32, #tpu.memory_space<vmem>>, vector<512x128xf32>,
    } else {
    }
    return
  }
  func.func @transform_0(%arg0: i32, %arg1: i32) -> (i32, i32) {
    %c0_i32 = arith.constant 0 : i32
    return %arg0, %arg1 : i32, i32
  }
  func.func @transform_1(%arg0: i32, %arg1: i32) -> (i32, i32) {
    %c0_i32 = arith.constant 0 : i32
    %c0_i32_0 = arith.constant 0 : i32
    return %arg1, %c0_i32 : i32, i32
  }
  func.func @transform_2(%arg0: i32, %arg1: i32) -> (i32, i32) {
    %c0_i32 = arith.constant 0 : i32
    %c0_i32_0 = arith.constant 0 : i32
    %c0_i32_1 = arith.constant 0 : i32
    return %c0_i32, %c0_i32_0 : i32, i32
  }
  func.func @transform_3(%arg0: i32, %arg1: i32) -> (i32, i32) {
    %c0_i32 = arith.constant 0 : i32
    %c0_i32_0 = arith.constant 0 : i32
    return %arg0, %c0_i32 : i32, i32
  }
}

</mosaic_0001>

<bundles_post_ra>
// kernel: conv2d_block.1
= control target key start
LH: loop header
LB: loop body
LE: loop exit
PB: predicated region body
PF: predicated region fallthrough
CT: control target
= control target key end

     0   :  { %v2381_v0 = vmov 0   ;;  %s3184_s1 = inlined_call_operand.vmem [shape: bf16[384,128], index: 1, kind: input, shape index: {}]   ;;  %s3185_s0 = inlined_call_operand.vmem [shape: bf16[512,384], index: 0, kind: input, shape index: {}]   ;;  %s3186_s2 = inlined_call_operand.vmem [shape: f32[1,128], index: 2, kind: input, shape index: {}]   ;;  %s3187_s3 = inlined_call_operand.vmem [shape: f32[512,128], index: 3, kind: output, shape index: {}]  }
   0x1   :  { %979 = vmatprep.subr.bf16.mxu0 %v2381_v0  ;;  %2196 = vmatprep.subr.bf16.mxu1 %v2381_v0  ;;  %v2229_v1 = vld [vmem:[%s3184_s1] sm:$0xff]   ;;  %v2230_v2 = vld [vmem:[%s3184_s1 + $0x8] sm:$0xff]   ;;  %v2231_v3 = vld [vmem:[%s3184_s1 + $0x10] sm:$0xff]  }
   0x2   :  { %980 = vmatpush1.bf16.msra.mxu0 %v2229_v1  ;;  %2212 = vmatpush1.bf16.msra.mxu1 %v2229_v1  ;;  %v2232_v4 = vld [vmem:[%s3184_s1 + $0x18] sm:$0xff]   ;;  %v2233_v5 = vld [vmem:[%s3184_s1 + $0x20] sm:$0xff]   ;;  %v2234_v7 = vld [vmem:[%s3184_s1 + $0x28] sm:$0xff]  }
   0x3   :  { %981 = vmatprep.subr.bf16.mxu0 %v2381_v0  ;;  %2197 = vmatprep.subr.bf16.mxu1 %v2381_v0  ;;  %v2247_v6 = vld [vmem:[%s3185_s0 + $0x4] ss:$12 sps:$4 sm:$0xff]   ;;  %v2236_v10 = vld [vmem:[%s3184_s1 + $0x38] sm:$0xff]   ;;  %v2238_v12 = vld [vmem:[%s3184_s1 + $0x48] sm:$0xff]  }
   0x4   :  { %v2250_v8 = vld [vmem:[%s3185_s0 + $0x244] ss:$12 sps:$4 sm:$0xff]   ;;  %1011 = vmatprep.mubr.bf16.mxu0 %v2247_v6  ;;  %v2240_v14 = vld [vmem:[%s3184_s1 + $0x58] sm:$0xff]   ;;  %v2242_v16 = vld [vmem:[%s3184_s1 + $0x68] sm:$0xff]  }
   0x5   :  { %1203 = vmatprep.mubr.bf16.mxu1 %v2250_v8  ;;  %v2235_v9 = vld [vmem:[%s3184_s1 + $0x30] sm:$0xff]   ;;  %v2237_v11 = vld [vmem:[%s3184_s1 + $0x40] sm:$0xff]   ;;  %v2244_v18 = vld [vmem:[%s3184_s1 + $0x78] sm:$0xff]  }
   0x6   :  { %982 = vmatpush1.bf16.msra.mxu0 %v2230_v2  ;;  %2213 = vmatpush1.bf16.msra.mxu1 %v2230_v2  ;;  %v2239_v13 = vld [vmem:[%s3184_s1 + $0x50] sm:$0xff]   ;;  %v2241_v15 = vld [vmem:[%s3184_s1 + $0x60] sm:$0xff]   ;;  %v2252_v22 = vld [vmem:[%s3185_s0 + $0x1c] ss:$12 sps:$4 sm:$0xff]  }
   0x7   :  { %983 = vmatprep.subr.bf16.mxu0 %v2381_v0  ;;  %2198 = vmatprep.subr.bf16.mxu1 %v2381_v0  ;;  %v2243_v17 = vld [vmem:[%s3184_s1 + $0x70] sm:$0xff]   ;;  %v2251_v19 = vld [vmem:[%s3184_s1 + $0x80] sm:$0xff]   ;;  %v2254_v23 = vld [vmem:[%s3185_s0 + $0x25c] ss:$12 sps:$4 sm:$0xff]  }
   0x8   :  { %v2245_v20 = vld [vmem:[%s3185_s0] ss:$12 sps:$4 sm:$0xff]   ;;  %v2265_v25 = vld [vmem:[%s3184_s1 + $0x90] sm:$0xff]   ;;  %v2256_v26 = vld [vmem:[%s3185_s0 + $0x18] ss:$12 sps:$4 sm:$0xff]  }
   0x9   :  { %v2248_v21 = vld [vmem:[%s3185_s0 + $0x240] ss:$12 sps:$4 sm:$0xff]   ;;  %v2257_v27 = vld [vmem:[%s3185_s0 + $0x258] ss:$12 sps:$4 sm:$0xff]   ;;  %v2263_v31 = vld [vmem:[%s3185_s0 + $0x30] ss:$12 sps:$4 sm:$0xff]  }
   0xa   :  { %984 = vmatpush1.bf16.msra.mxu0 %v2231_v3  ;;  %2214 = vmatpush1.bf16.msra.mxu1 %v2231_v3  ;;  %v2258_v24 = vld [vmem:[%s3184_s1 + $0x88] sm:$0xff]   ;;  %v2259_v28 = vld [vmem:[%s3185_s0 + $0x34] ss:$12 sps:$4 sm:$0xff]   ;;  %v2272_v30 = vld [vmem:[%s3184_s1 + $0x98] sm:$0xff]  }
   0xb   :  { %985 = vmatprep.subr.bf16.mxu0 %v2381_v0  ;;  %2199 = vmatprep.subr.bf16.mxu1 %v2381_v0  ;;  %v2261_v29 = vld [vmem:[%s3185_s0 + $0x274] ss:$12 sps:$4 sm:$0xff]   ;;  %v2264_v33 = vld [vmem:[%s3185_s0 + $0x270] ss:$12 sps:$4 sm:$0xff]   ;;  %v2266_v34 = vld [vmem:[%s3185_s0 + $0x4c] ss:$12 sps:$4 sm:$0xff]  }
   0xc   :  { %v2279_v32 = vld [vmem:[%s3184_s1 + $0xa0] sm:$0xff]   ;;  %v2268_v35 = vld [vmem:[%s3185_s0 + $0x28c] ss:$12 sps:$4 sm:$0xff]   ;;  %v2270_v37 = vld [vmem:[%s3185_s0 + $0x48] ss:$12 sps:$4 sm:$0xff]  }
   0xd   :  { %v2286_v36 = vld [vmem:[%s3184_s1 + $0xa8] sm:$0xff]   ;;  %v2273_v39 = vld [vmem:[%s3185_s0 + $0x64] ss:$12 sps:$4 sm:$0xff]   ;;  %v2300_v42 = vld [vmem:[%s3184_s1 + $0xb8] sm:$0xff]  }
   0xe   :  { %986 = vmatpush1.bf16.msra.mxu0 %v2232_v4  ;;  %2215 = vmatpush1.bf16.msra.mxu1 %v2232_v4  ;;  %v2271_v38 = vld [vmem:[%s3185_s0 + $0x288] ss:$12 sps:$4 sm:$0xff]   ;;  %v2275_v40 = vld [vmem:[%s3185_s0 + $0x2a4] ss:$12 sps:$4 sm:$0xff]   ;;  %v2277_v43 = vld [vmem:[%s3185_s0 + $0x60] ss:$12 sps:$4 sm:$0xff]  }
   0xf   :  { %987 = vmatprep.subr.bf16.mxu0 %v2381_v0  ;;  %2200 = vmatprep.subr.bf16.mxu1 %v2381_v0  ;;  %v2293_v41 = vld [vmem:[%s3184_s1 + $0xb0] sm:$0xff]   ;;  %v2278_v44 = vld [vmem:[%s3185_s0 + $0x2a0] ss:$12 sps:$4 sm:$0xff]   ;;  %v2280_v45 = vld [vmem:[%s3185_s0 + $0x7c] ss:$12 sps:$4 sm:$0xff]  }
  0x10   :  { %v2282_v46 = vld [vmem:[%s3185_s0 + $0x2bc] ss:$12 sps:$4 sm:$0xff]   ;;  %v2284_v47 = vld [vmem:[%s3185_s0 + $0x78] ss:$12 sps:$4 sm:$0xff]   ;;  %v2287_v49 = vld [vmem:[%s3185_s0 + $0x94] ss:$12 sps:$4 sm:$0xff]  }
  0x11   :  { %v2285_v48 = vld [vmem:[%s3185_s0 + $0x2b8] ss:$12 sps:$4 sm:$0xff]   ;;  %v2289_v50 = vld [vmem:[%s3185_s0 + $0x2d4] ss:$12 sps:$4 sm:$0xff]   ;;  %v2291_v51 = vld [vmem:[%s3185_s0 + $0x90] ss:$12 sps:$4 sm:$0xff]  }
  0x12   :  { %988 = vmatpush1.bf16.msra.mxu0 %v2233_v5  ;;  %2216 = vmatpush1.bf16.msra.mxu1 %v2233_v5  ;;  %v2292_v52 = vld [vmem:[%s3185_s0 + $0x2d0] ss:$12 sps:$4 sm:$0xff]   ;;  %v2294_v53 = vld [vmem:[%s3185_s0 + $0xac] ss:$12 sps:$4 sm:$0xff]   ;;  %v2298_v55 = vld [vmem:[%s3185_s0 + $0xa8] ss:$12 sps:$4 sm:$0xff]  }
  0x13   :  { %989 = vmatprep.subr.bf16.mxu0 %v2381_v0  ;;  %2201 = vmatprep.subr.bf16.mxu1 %v2381_v0  ;;  %v2296_v54 = vld [vmem:[%s3185_s0 + $0x2ec] ss:$12 sps:$4 sm:$0xff]   ;;  %v2299_v56 = vld [vmem:[%s3185_s0 + $0x2e8] ss:$12 sps:$4 sm:$0xff]   ;;  %v2301_v57 = vld [vmem:[%s3185_s0 + $0xc4] ss:$12 sps:$4 sm:$0xff]  }
  0x14   :  { %v2303_v58 = vld [vmem:[%s3185_s0 + $0x8] ss:$12 sps:$4 sm:$0xff]   ;;  %v2304_v59 = vld [vmem:[%s3185_s0 + $0xc0] ss:$12 sps:$4 sm:$0xff]   ;;  %v2308_v62 = vld [vmem:[%s3185_s0 + $0x38] ss:$12 sps:$4 sm:$0xff]  }
  0x15   :  { %v2305_v60 = vld [vmem:[%s3185_s0 + $0x20] ss:$12 sps:$4 sm:$0xff]   ;;  %v2306_v61 = vld [vmem:[%s3185_s0 + $0xdc] ss:$12 sps:$4 sm:$0xff]   ;;  %v2309_v63 = vld [vmem:[%s3185_s0 + $0xd8] ss:$12 sps:$4 sm:$0xff]  }
  0x16   :  { %990 = vmatpush1.bf16.msra.mxu0 %v2234_v7  ;;  %2217 = vmatpush1.bf16.msra.mxu1 %v2234_v7  ;;  %v2311_v1 = vld [vmem:[%s3185_s0 + $0xf4] ss:$12 sps:$4 sm:$0xff]   ;;  %v2314_v3 = vld [vmem:[%s3185_s0 + $0xf0] ss:$12 sps:$4 sm:$0xff]   ;;  %v2316_v5 = vld [vmem:[%s3185_s0 + $0x10c] ss:$12 sps:$4 sm:$0xff]  }
  0x17   :  { %991 = vmatprep.subr.bf16.mxu0 %v2381_v0  ;;  %2202 = vmatprep.subr.bf16.mxu1 %v2381_v0  ;;  %v2313_v2 = vld [vmem:[%s3185_s0 + $0x68] ss:$12 sps:$4 sm:$0xff]   ;;  %v2315_v4 = vld [vmem:[%s3185_s0 + $0x80] ss:$12 sps:$4 sm:$0xff]   ;;  %v2318_v6 = vld [vmem:[%s3185_s0 + $0x98] ss:$12 sps:$4 sm:$0xff]  }
  0x18   :  { %v2319_v7 = vld [vmem:[%s3185_s0 + $0x108] ss:$12 sps:$4 sm:$0xff]   ;;  %v2320_v8 = vld [vmem:[%s3185_s0 + $0xb0] ss:$12 sps:$4 sm:$0xff]  }
  0x1a   :  { %992 = vmatpush1.bf16.msra.mxu0 %v2235_v9  ;;  %2218 = vmatpush1.bf16.msra.mxu1 %v2235_v9  ;;  %v2321_v9 = vld [vmem:[%s3185_s0 + $0x124] ss:$12 sps:$4 sm:$0xff]  }
  0x1b   :  { %993 = vmatprep.subr.bf16.mxu0 %v2381_v0  ;;  %2203 = vmatprep.subr.bf16.mxu1 %v2381_v0 }
  0x1e   :  { %994 = vmatpush1.bf16.msra.mxu0 %v2236_v10  ;;  %2219 = vmatpush1.bf16.msra.mxu1 %v2236_v10  ;;  %v2323_v10 = vld [vmem:[%s3185_s0 + $0xc8] ss:$12 sps:$4 sm:$0xff]  }
  0x1f   :  { %995 = vmatprep.subr.bf16.mxu0 %v2381_v0  ;;  %2204 = vmatprep.subr.bf16.mxu1 %v2381_v0 }
  0x22   :  { %996 = vmatpush1.bf16.msra.mxu0 %v2237_v11  ;;  %2220 = vmatpush1.bf16.msra.mxu1 %v2237_v11  ;;  %v2324_v11 = vld [vmem:[%s3185_s0 + $0x120] ss:$12 sps:$4 sm:$0xff]  }
  0x23   :  { %997 = vmatprep.subr.bf16.mxu0 %v2381_v0  ;;  %2205 = vmatprep.subr.bf16.mxu1 %v2381_v0 }
  0x26   :  { %998 = vmatpush1.bf16.msra.mxu0 %v2238_v12  ;;  %2221 = vmatpush1.bf16.msra.mxu1 %v2238_v12  ;;  %v2325_v12 = vld [vmem:[%s3185_s0 + $0xe0] ss:$12 sps:$4 sm:$0xff]  }
  0x27   :  { %999 = vmatprep.subr.bf16.mxu0 %v2381_v0  ;;  %2206 = vmatprep.subr.bf16.mxu1 %v2381_v0 }
  0x2a   :  { %1000 = vmatpush1.bf16.msra.mxu0 %v2239_v13  ;;  %2222 = vmatpush1.bf16.msra.mxu1 %v2239_v13  ;;  %v2326_v13 = vld [vmem:[%s3185_s0 + $0x13c] ss:$12 sps:$4 sm:$0xff]  }
  0x2b   :  { %1001 = vmatprep.subr.bf16.mxu0 %v2381_v0  ;;  %2207 = vmatprep.subr.bf16.mxu1 %v2381_v0 }
  0x2e   :  { %1002 = vmatpush1.bf16.msra.mxu0 %v2240_v14  ;;  %2223 = vmatpush1.bf16.msra.mxu1 %v2240_v14  ;;  %v2328_v14 = vld [vmem:[%s3185_s0 + $0xf8] ss:$12 sps:$4 sm:$0xff]  }
  0x2f   :  { %1003 = vmatprep.subr.bf16.mxu0 %v2381_v0  ;;  %2208 = vmatprep.subr.bf16.mxu1 %v2381_v0 }
  0x32   :  { %1004 = vmatpush1.bf16.msra.mxu0 %v2241_v15  ;;  %2224 = vmatpush1.bf16.msra.mxu1 %v2241_v15  ;;  %v2329_v15 = vld [vmem:[%s3185_s0 + $0x138] ss:$12 sps:$4 sm:$0xff]  }
  0x33   :  { %1005 = vmatprep.subr.bf16.mxu0 %v2381_v0  ;;  %2209 = vmatprep.subr.bf16.mxu1 %v2381_v0 }
  0x36   :  { %1006 = vmatpush1.bf16.msra.mxu0 %v2242_v16  ;;  %2225 = vmatpush1.bf16.msra.mxu1 %v2242_v16  ;;  %v2330_v16 = vld [vmem:[%s3185_s0 + $0x110] ss:$12 sps:$4 sm:$0xff]  }
  0x37   :  { %1007 = vmatprep.subr.bf16.mxu0 %v2381_v0  ;;  %2210 = vmatprep.subr.bf16.mxu1 %v2381_v0 }
  0x3a   :  { %1008 = vmatpush1.bf16.msra.mxu0 %v2243_v17  ;;  %2226 = vmatpush1.bf16.msra.mxu1 %v2243_v17  ;;  %v2331_v17 = vld [vmem:[%s3185_s0 + $0x154] ss:$12 sps:$4 sm:$0xff]  }
  0x3b   :  { %1009 = vmatprep.subr.bf16.mxu0 %v2381_v0  ;;  %2211 = vmatprep.subr.bf16.mxu1 %v2381_v0  ;;  %v2310_v0 = vld [vmem:[%s3185_s0 + $0x50] ss:$12 sps:$4 sm:$0xff]  }
  0x3e   :  { %1010 = vmatpush1.bf16.msra.mxu0 %v2244_v18  ;;  %2227 = vmatpush1.bf16.msra.mxu1 %v2244_v18  ;;  %v2333_v18 = vld [vmem:[%s3185_s0 + $0x128] ss:$12 sps:$4 sm:$0xff]  }
  0x3f   :  { %2116 = vmatprep.subr.bf16.mxu1 %v2251_v19 }
  0x41   :  { %1012 = vmatmul.mubr.bf16.vlgmr.msra.gmra.mrb[0].mxu0 %v2245_v20  ;;  %1204 = vmatmul.mubr.bf16.vlgmr.msra.gmra.mrb[0].mxu1 %v2248_v21  ;;  %v2335_v20 = vld [vmem:[%s3185_s0 + $0x140] ss:$12 sps:$4 sm:$0xff]  }
  0x42   :  { %2117 = vmatpush3.bf16.msra.mxu1 %v2251_v19  ;;  %1019 = vmatprep.mubr.bf16.mxu0 %v2252_v22  ;;  %v2334_v19 = vld [vmem:[%s3185_s0 + $0x150] ss:$12 sps:$4 sm:$0xff]   ;;  %v2336_v21 = vld [vmem:[%s3185_s0 + $0x16c] ss:$12 sps:$4 sm:$0xff]  }
  0x43   :  { %1211 = vmatprep.mubr.bf16.mxu1 %v2254_v23  ;;  %2118 = vmatprep.subr.bf16.mxu1 %v2258_v24  ;;  %v2338_v22 = vld [vmem:[%s3185_s0 + $0x158] ss:$12 sps:$4 sm:$0xff]   ;;  %v2339_v23 = vld [vmem:[%s3185_s0 + $0x168] ss:$12 sps:$4 sm:$0xff]  }
  0x46   :  { %2119 = vmatpush3.bf16.msra.mxu1 %v2258_v24  ;;  %v2340_v24 = vld [vmem:[%s3185_s0 + $0x170] ss:$12 sps:$4 sm:$0xff]  }
  0x47   :  { %2120 = vmatprep.subr.bf16.mxu1 %v2265_v25 }
  0x49   :  { %1020 = vmatmul.mubr.bf16.gmra.mrb[4].mxu0 %v2256_v26  ;;  %1212 = vmatmul.mubr.bf16.gmra.mrb[4].mxu1 %v2257_v27  ;;  %v2343_v26 = vld [vmem:[%s3185_s0 + $0x188] ss:$12 sps:$4 sm:$0xff]   ;;  %v2344_v27 = vld [vmem:[%s3185_s0 + $0x180] ss:$12 sps:$4 sm:$0xff]  }
  0x4a   :  { %1027 = vmatprep.mubr.bf16.mxu0 %v2259_v28  ;;  %1219 = vmatprep.mubr.bf16.mxu1 %v2261_v29  ;;  %v2345_v28 = vld [vmem:[%s3185_s0 + $0x1a0] ss:$12 sps:$4 sm:$0xff]   ;;  %v2346_v29 = vld [vmem:[%s3185_s0 + $0x19c] ss:$12 sps:$4 sm:$0xff]  }
  0x4b   :  { %2121 = vmatpush3.bf16.msra.mxu1 %v2265_v25  ;;  %v2341_v25 = vld [vmem:[%s3185_s0 + $0x184] ss:$12 sps:$4 sm:$0xff]  }
  0x4c   :  { %2122 = vmatprep.subr.bf16.mxu1 %v2272_v30 }
  0x4f   :  { %2123 = vmatpush3.bf16.msra.mxu1 %v2272_v30  ;;  %v2348_v30 = vld [vmem:[%s3185_s0 + $0x1b8] ss:$12 sps:$4 sm:$0xff]  }
  0x50   :  { %2124 = vmatprep.subr.bf16.mxu1 %v2279_v32 }
  0x51   :  { %1028 = vmatmul.mubr.bf16.gmra.mrb[8].mxu0 %v2263_v31  ;;  %1220 = vmatmul.mubr.bf16.gmra.mrb[8].mxu1 %v2264_v33  ;;  %v2349_v31 = vld [vmem:[%s3185_s0 + $0x198] ss:$12 sps:$4 sm:$0xff]   ;;  %v2351_v33 = vld [vmem:[%s3185_s0 + $0x1b4] ss:$12 sps:$4 sm:$0xff]  }
  0x52   :  { %1035 = vmatprep.mubr.bf16.mxu0 %v2266_v34  ;;  %1227 = vmatprep.mubr.bf16.mxu1 %v2268_v35  ;;  %v2353_v34 = vld [vmem:[%s3185_s0 + $0x1e8] ss:$12 sps:$4 sm:$0xff]   ;;  %v2354_v35 = vld [vmem:[%s3185_s0 + $0x1b0] ss:$12 sps:$4 sm:$0xff]  }
  0x53   :  { %2125 = vmatpush3.bf16.msra.mxu1 %v2279_v32  ;;  %v2350_v32 = vld [vmem:[%s3185_s0 + $0x1d0] ss:$12 sps:$4 sm:$0xff]  }
  0x54   :  { %2126 = vmatprep.subr.bf16.mxu1 %v2286_v36 }
  0x57   :  { %2127 = vmatpush3.bf16.msra.mxu1 %v2286_v36  ;;  %v2355_v36 = vld [vmem:[%s3185_s0 + $0x200] ss:$12 sps:$4 sm:$0xff]  }
  0x58   :  { %2128 = vmatprep.subr.bf16.mxu1 %v2293_v41 }
  0x59   :  { %1036 = vmatmul.mubr.bf16.gmra.mrb[12].mxu0 %v2270_v37  ;;  %1228 = vmatmul.mubr.bf16.gmra.mrb[12].mxu1 %v2271_v38  ;;  %v2356_v37 = vld [vmem:[%s3185_s0 + $0x1cc] ss:$12 sps:$4 sm:$0xff]  }
  0x5a   :  { %1043 = vmatprep.mubr.bf16.mxu0 %v2273_v39  ;;  %1235 = vmatprep.mubr.bf16.mxu1 %v2275_v40  ;;  %v2358_v38 = vld [vmem:[%s3185_s0 + $0x218] ss:$12 sps:$4 sm:$0xff]   ;;  %v2359_v39 = vld [vmem:[%s3185_s0 + $0x1c8] ss:$12 sps:$4 sm:$0xff]   ;;  %v2360_v40 = vld [vmem:[%s3185_s0 + $0x230] ss:$12 sps:$4 sm:$0xff]  }
  0x5b   :  { %2129 = vmatpush3.bf16.msra.mxu1 %v2293_v41  ;;  %v2361_v41 = vld [vmem:[%s3185_s0 + $0x1e4] ss:$12 sps:$4 sm:$0xff]  }
  0x5c   :  { %2130 = vmatprep.subr.bf16.mxu1 %v2300_v42 }
  0x5f   :  { %2131 = vmatpush3.bf16.msra.mxu1 %v2300_v42  ;;  %v2363_v42 = vld [vmem:[%s3185_s0 + $0x248] ss:$12 sps:$4 sm:$0xff]  }
  0x61   :  { %1044 = vmatmul.mubr.bf16.gmra.mrb[16].mxu0 %v2277_v43  ;;  %1236 = vmatmul.mubr.bf16.gmra.mrb[16].mxu1 %v2278_v44  ;;  %v2364_v43 = vld [vmem:[%s3185_s0 + $0x1e0] ss:$12 sps:$4 sm:$0xff]  }
  0x62   :  { %1051 = vmatprep.mubr.bf16.mxu0 %v2280_v45  ;;  %1243 = vmatprep.mubr.bf16.mxu1 %v2282_v46  ;;  %v2365_v44 = vld [vmem:[%s3185_s0 + $0x260] ss:$12 sps:$4 sm:$0xff]   ;;  %v2366_v45 = vld [vmem:[%s3185_s0 + $0x1fc] ss:$12 sps:$4 sm:$0xff]   ;;  %v2368_v46 = vld [vmem:[%s3185_s0 + $0x278] ss:$12 sps:$4 sm:$0xff]  }
  0x69   :  { %1052 = vmatmul.mubr.bf16.gmra.mrb[20].mxu0 %v2284_v47  ;;  %1244 = vmatmul.mubr.bf16.gmra.mrb[20].mxu1 %v2285_v48  ;;  %v2369_v47 = vld [vmem:[%s3185_s0 + $0x1f8] ss:$12 sps:$4 sm:$0xff]   ;;  %v2370_v48 = vld [vmem:[%s3185_s0 + $0x290] ss:$12 sps:$4 sm:$0xff]  }
  0x6a   :  { %1059 = vmatprep.mubr.bf16.mxu0 %v2287_v49  ;;  %1251 = vmatprep.mubr.bf16.mxu1 %v2289_v50  ;;  %v2371_v49 = vld [vmem:[%s3185_s0 + $0x214] ss:$12 sps:$4 sm:$0xff]  }
  0x6b   :  { %v2373_v50 = vld [vmem:[%s3185_s0 + $0x2a8] ss:$12 sps:$4 sm:$0xff]  }
  0x71   :  { %1060 = vmatmul.mubr.bf16.gmra.mrb[24].mxu0 %v2291_v51  ;;  %1252 = vmatmul.mubr.bf16.gmra.mrb[24].mxu1 %v2292_v52  ;;  %v2374_v51 = vld [vmem:[%s3185_s0 + $0x210] ss:$12 sps:$4 sm:$0xff]   ;;  %v2375_v52 = vld [vmem:[%s3185_s0 + $0x2c0] ss:$12 sps:$4 sm:$0xff]  }
  0x72   :  { %1067 = vmatprep.mubr.bf16.mxu0 %v2294_v53  ;;  %1259 = vmatprep.mubr.bf16.mxu1 %v2296_v54  ;;  %v2376_v53 = vld [vmem:[%s3185_s0 + $0x22c] ss:$12 sps:$4 sm:$0xff]  }
  0x73   :  { %v2378_v54 = vld [vmem:[%s3185_s0 + $0x2d8] ss:$12 sps:$4 sm:$0xff]  }
  0x79   :  { %1068 = vmatmul.mubr.bf16.gmra.mrb[28].mxu0 %v2298_v55  ;;  %1260 = vmatmul.mubr.bf16.gmra.mrb[28].mxu1 %v2299_v56  ;;  %v2379_v55 = vld [vmem:[%s3185_s0 + $0x228] ss:$12 sps:$4 sm:$0xff]   ;;  %v2380_v56 = vld [vmem:[%s3185_s0 + $0x2f0] ss:$12 sps:$4 sm:$0xff]  }
  0x7a   :  { %1075 = vmatprep.mubr.bf16.mxu0 %v2301_v57  ;;  %2132 = vmatprep.mubr.bf16.mxu1 %v2303_v58 }
  0x81   :  { %1076 = vmatmul.mubr.bf16.gmra.mrb[32].mxu0 %v2304_v59  ;;  %2133 = vmatmul.mubr.bf16.vlgmr.msra.gmra.mrb[32].mxu1 %v2305_v60 }
  0x82   :  { %1083 = vmatprep.mubr.bf16.mxu0 %v2306_v61  ;;  %2136 = vmatprep.mubr.bf16.mxu1 %v2308_v62 }
  0x89   :  { %1084 = vmatmul.mubr.bf16.gmra.mrb[36].mxu0 %v2309_v63  ;;  %2137 = vmatmul.mubr.bf16.gmra.mrb[36].mxu1 %v2310_v0 }
  0x8a   :  { %1091 = vmatprep.mubr.bf16.mxu0 %v2311_v1  ;;  %2140 = vmatprep.mubr.bf16.mxu1 %v2313_v2 }
  0x91   :  { %1092 = vmatmul.mubr.bf16.gmra.mrb[40].mxu0 %v2314_v3  ;;  %2141 = vmatmul.mubr.bf16.gmra.mrb[40].mxu1 %v2315_v4 }
  0x92   :  { %1099 = vmatprep.mubr.bf16.mxu0 %v2316_v5  ;;  %2144 = vmatprep.mubr.bf16.mxu1 %v2318_v6 }
  0x99   :  { %1100 = vmatmul.mubr.bf16.gmra.mrb[44].mxu0 %v2319_v7  ;;  %2145 = vmatmul.mubr.bf16.gmra.mrb[44].mxu1 %v2320_v8 }
  0x9a   :  { %1107 = vmatprep.mubr.bf16.mxu0 %v2321_v9  ;;  %2148 = vmatprep.mubr.bf16.mxu1 %v2323_v10 }
  0xa1   :  { %1108 = vmatmul.mubr.bf16.gmra.mrb[48].mxu0 %v2324_v11  ;;  %2149 = vmatmul.mubr.bf16.gmra.mrb[48].mxu1 %v2325_v12 }
  0xa2   :  { %1115 = vmatprep.mubr.bf16.mxu0 %v2326_v13  ;;  %2152 = vmatprep.mubr.bf16.mxu1 %v2328_v14 }
  0xa9   :  { %1116 = vmatmul.mubr.bf16.gmra.mrb[52].mxu0 %v2329_v15  ;;  %2153 = vmatmul.mubr.bf16.gmra.mrb[52].mxu1 %v2330_v16 }
  0xaa   :  { %1123 = vmatprep.mubr.bf16.mxu0 %v2331_v17  ;;  %2156 = vmatprep.mubr.bf16.mxu1 %v2333_v18 }
  0xb1   :  { %1124 = vmatmul.mubr.bf16.gmra.mrb[56].mxu0 %v2334_v19  ;;  %2157 = vmatmul.mubr.bf16.gmra.mrb[56].mxu1 %v2335_v20 }
  0xb2   :  { %1131 = vmatprep.mubr.bf16.mxu0 %v2336_v21  ;;  %2160 = vmatprep.mubr.bf16.mxu1 %v2338_v22 }
  0xb9   :  { %1132 = vmatmul.mubr.bf16.gmra.mrb[60].mxu0 %v2339_v23  ;;  %2161 = vmatmul.mubr.bf16.gmra.mrb[60].mxu1 %v2340_v24 }
  0xba   :  { %1139 = vmatprep.mubr.bf16.mxu0 %v2341_v25  ;;  %2164 = vmatprep.mubr.bf16.mxu1 %v2343_v26 }
  0xc1   :  { %1140 = vmatmul.mubr.bf16.gmra.mrb[64].mxu0 %v2344_v27  ;;  %2165 = vmatmul.mubr.bf16.gmra.mrb[64].mxu1 %v2345_v28 }
  0xc2   :  { %1147 = vmatprep.mubr.bf16.mxu0 %v2346_v29  ;;  %2168 = vmatprep.mubr.bf16.mxu1 %v2348_v30 }
  0xc9   :  { %1148 = vmatmul.mubr.bf16.gmra.mrb[68].mxu0 %v2349_v31  ;;  %2169 = vmatmul.mubr.bf16.gmra.mrb[68].mxu1 %v2350_v32 }
  0xca   :  { %1155 = vmatprep.mubr.bf16.mxu0 %v2351_v33  ;;  %2172 = vmatprep.mubr.bf16.mxu1 %v2353_v34 }
  0xd1   :  { %1156 = vmatmul.mubr.bf16.gmra.mrb[72].mxu0 %v2354_v35  ;;  %2173 = vmatmul.mubr.bf16.gmra.mrb[72].mxu1 %v2355_v36 }
  0xd2   :  { %1163 = vmatprep.mubr.bf16.mxu0 %v2356_v37  ;;  %2176 = vmatprep.mubr.bf16.mxu1 %v2358_v38 }
  0xd9   :  { %1164 = vmatmul.mubr.bf16.gmra.mrb[76].mxu0 %v2359_v39  ;;  %2177 = vmatmul.mubr.bf16.gmra.mrb[76].mxu1 %v2360_v40 }
  0xda   :  { %1171 = vmatprep.mubr.bf16.mxu0 %v2361_v41  ;;  %2180 = vmatprep.mubr.bf16.mxu1 %v2363_v42 }
  0xe1   :  { %1172 = vmatmul.mubr.bf16.gmra.mrb[80].mxu0 %v2364_v43  ;;  %2181 = vmatmul.mubr.bf16.gmra.mrb[80].mxu1 %v2365_v44 }
  0xe2   :  { %1179 = vmatprep.mubr.bf16.mxu0 %v2366_v45  ;;  %2184 = vmatprep.mubr.bf16.mxu1 %v2368_v46 }
  0xe9   :  { %1180 = vmatmul.mubr.bf16.gmra.mrb[84].mxu0 %v2369_v47  ;;  %2185 = vmatmul.mubr.bf16.gmra.mrb[84].mxu1 %v2370_v48 }
  0xea   :  { %1187 = vmatprep.mubr.bf16.mxu0 %v2371_v49  ;;  %2188 = vmatprep.mubr.bf16.mxu1 %v2373_v50 }
  0xf1   :  { %1188 = vmatmul.mubr.bf16.gmra.mrb[88].mxu0 %v2374_v51  ;;  %2189 = vmatmul.mubr.bf16.gmra.mrb[88].mxu1 %v2375_v52 }
  0xf2   :  { %1195 = vmatprep.mubr.bf16.mxu0 %v2376_v53  ;;  %2192 = vmatprep.mubr.bf16.mxu1 %v2378_v54 }
  0xf9   :  { %1196 = vmatmul.mubr.bf16.gmra.mrb[92].mxu0 %v2379_v55  ;;  %2193 = vmatmul.mubr.bf16.gmra.mrb[92].mxu1 %v2380_v56 }
 0x114   :  { %v2794_v57 = vpop.f32.mrb[0].mxu0  ;;  %v2796_v58 = vpop.f32.mrb[0].mxu1 }
 0x115   :  { %v1015_v59 = vpop.f32.mrb[1].mxu0  ;;  %v1207_v60 = vpop.f32.mrb[1].mxu1 }
 0x116   :  { %v2798_v61 = vpop.f32.mrb[2].mxu0  ;;  %v2800_v62 = vpop.f32.mrb[2].mxu1 }
 0x117   :  { %v1018_v63 = vpop.f32.mrb[3].mxu0  ;;  %v1210_v0 = vpop.f32.mrb[3].mxu1 }
 0x118   :  { %v2861_v63 = vld [vmem:[%s3186_s2] ss:$0 sm:$0xff] }
 0x11c   :  { %v1021_v1 = vpop.f32.mrb[4].mxu0  ;;  %v2802_v2 = vpop.f32.mrb[4].mxu1 }
 0x11d   :  { %v1023_v3 = vpop.f32.mrb[5].mxu0  ;;  %v1215_v4 = vpop.f32.mrb[5].mxu1 }
 0x11e   :  { %v2804_v5 = vpop.f32.mrb[6].mxu0  ;;  %v2806_v6 = vpop.f32.mrb[6].mxu1 }
 0x11f   :  { %v1026_v7 = vpop.f32.mrb[7].mxu0  ;;  %v1218_v8 = vpop.f32.mrb[7].mxu1 }
 0x124   :  { %v2808_v9 = vpop.f32.mrb[8].mxu0  ;;  %v2810_v10 = vpop.f32.mrb[8].mxu1 }
 0x125   :  { %v1031_v11 = vpop.f32.mrb[9].mxu0  ;;  %v1223_v12 = vpop.f32.mrb[9].mxu1 }
 0x126   :  { %v2812_v13 = vpop.f32.mrb[10].mxu0  ;;  %v2814_v14 = vpop.f32.mrb[10].mxu1 }
 0x127   :  { %v1034_v15 = vpop.f32.mrb[11].mxu0  ;;  %v1226_v16 = vpop.f32.mrb[11].mxu1 }
 0x12c   :  { %v2816_v17 = vpop.f32.mrb[12].mxu0  ;;  %v2818_v18 = vpop.f32.mrb[12].mxu1 }
 0x12d   :  { %v1039_v19 = vpop.f32.mrb[13].mxu0  ;;  %v1231_v20 = vpop.f32.mrb[13].mxu1 }
 0x12e   :  { %v2820_v21 = vpop.f32.mrb[14].mxu0  ;;  %v2822_v22 = vpop.f32.mrb[14].mxu1 }
 0x12f   :  { %v1042_v23 = vpop.f32.mrb[15].mxu0  ;;  %v1234_v24 = vpop.f32.mrb[15].mxu1 }
 0x134   :  { %v2824_v25 = vpop.f32.mrb[16].mxu0  ;;  %v2826_v26 = vpop.f32.mrb[16].mxu1 }
 0x135   :  { %v1047_v27 = vpop.f32.mrb[17].mxu0  ;;  %v1239_v28 = vpop.f32.mrb[17].mxu1 }
 0x136   :  { %v2828_v29 = vpop.f32.mrb[18].mxu0  ;;  %v2830_v30 = vpop.f32.mrb[18].mxu1 }
 0x137   :  { %v1050_v31 = vpop.f32.mrb[19].mxu0  ;;  %v1242_v32 = vpop.f32.mrb[19].mxu1 }
 0x13c   :  { %v2832_v33 = vpop.f32.mrb[20].mxu0  ;;  %v2834_v34 = vpop.f32.mrb[20].mxu1 }
 0x13d   :  { %v1055_v35 = vpop.f32.mrb[21].mxu0  ;;  %v1247_v36 = vpop.f32.mrb[21].mxu1 }
 0x13e   :  { %v2836_v37 = vpop.f32.mrb[22].mxu0  ;;  %v2838_v38 = vpop.f32.mrb[22].mxu1 }
 0x13f   :  { %v1058_v39 = vpop.f32.mrb[23].mxu0  ;;  %v1250_v40 = vpop.f32.mrb[23].mxu1 }
 0x144   :  { %v2840_v41 = vpop.f32.mrb[24].mxu0  ;;  %v2842_v42 = vpop.f32.mrb[24].mxu1 }
 0x145   :  { %v1063_v43 = vpop.f32.mrb[25].mxu0  ;;  %v1255_v44 = vpop.f32.mrb[25].mxu1 }
 0x146   :  { %v2844_v45 = vpop.f32.mrb[26].mxu0  ;;  %v2846_v46 = vpop.f32.mrb[26].mxu1 }
 0x147   :  { %v1066_v47 = vpop.f32.mrb[27].mxu0  ;;  %v1258_v48 = vpop.f32.mrb[27].mxu1 }
 0x14c   :  { %v2848_v49 = vpop.f32.mrb[28].mxu0  ;;  %v2850_v50 = vpop.f32.mrb[28].mxu1 }
 0x14d   :  { %v1071_v51 = vpop.f32.mrb[29].mxu0  ;;  %v1263_v52 = vpop.f32.mrb[29].mxu1 }
 0x14e   :  { %v2852_v53 = vpop.f32.mrb[30].mxu0  ;;  %v2854_v54 = vpop.f32.mrb[30].mxu1 }
 0x14f   :  { %v1074_v55 = vpop.f32.mrb[31].mxu0  ;;  %v1266_v56 = vpop.f32.mrb[31].mxu1 }
 0x154   :  { %v2856_v59 = vpop.f32.mrb[32].mxu0  ;;  %v2134_v60 = vpop.f32.mrb[32].mxu1 }
 0x155   :  { %v1311_v0 = vadd.f32 %v2134_v60, %v1021_v1  ;;  %v1079_v3 = vpop.f32.mrb[33].mxu0  ;;  %v1302_v4 = vpop.f32.mrb[33].mxu1 }
 0x156   :  { %v1303_v7 = vadd.f32 %v1302_v4, %v2794_v57  ;;  %v2864_v8 = vpop.f32.mrb[34].mxu0  ;;  %v2135_v11 = vpop.f32.mrb[34].mxu1 }
 0x157   :  { %v1761_v12 = vadd.f32 %v2861_v63, %v1311_v0  ;;  %v1314_v15 = vadd.f32 %v2135_v11, %v2804_v5  ;;  %v1082_v16 = vpop.f32.mrb[35].mxu0  ;;  %v1305_v19 = vpop.f32.mrb[35].mxu1 }
 0x158   :  { %v1759_v20 = vadd.f32 %v2861_v63, %v1303_v7  ;;  %v1306_v23 = vadd.f32 %v1305_v19, %v2798_v61 }
 0x159   :  { %v1825_v24 = vmax.f32 %v1761_v12, 0.0  ;;  %v1762_v1 = vadd.f32 %v2861_v63, %v1314_v15 }
 0x15a   :  { %v1823_v27 = vmax.f32 %v1759_v20, 0.0  ;;  %v1760_v28 = vadd.f32 %v2861_v63, %v1306_v23 }
 0x15b   :  { %1889 = vst [vmem:[%s3187_s3 + $0x10] sm:$0xff] %v1825_v24  ;;  %v1826_v57 = vmax.f32 %v1762_v1, 0.0 }
 0x15c   :  { %1887 = vst [vmem:[%s3187_s3] sm:$0xff] %v1823_v27  ;;  %v1824_v5 = vmax.f32 %v1760_v28, 0.0  ;;  %v2878_v31 = vpop.f32.mrb[36].mxu0  ;;  %v2138_v32 = vpop.f32.mrb[36].mxu1 }
 0x15d   :  { %1890 = vst [vmem:[%s3187_s3 + $0x18] sm:$0xff] %v1826_v57  ;;  %v1327_v61 = vadd.f32 %v2138_v32, %v2816_v17  ;;  %v1087_v35 = vpop.f32.mrb[37].mxu0  ;;  %v1318_v36 = vpop.f32.mrb[37].mxu1 }
 0x15e   :  { %1888 = vst [vmem:[%s3187_s3 + $0x8] sm:$0xff] %v1824_v5  ;;  %v1319_v39 = vadd.f32 %v1318_v36, %v2808_v9  ;;  %v2888_v40 = vpop.f32.mrb[38].mxu0  ;;  %v2139_v43 = vpop.f32.mrb[38].mxu1 }
 0x15f   :  { %v1765_v44 = vadd.f32 %v2861_v63, %v1327_v61  ;;  %v1330_v47 = vadd.f32 %v2139_v43, %v2820_v21  ;;  %v1090_v48 = vpop.f32.mrb[39].mxu0  ;;  %v1321_v51 = vpop.f32.mrb[39].mxu1 }
 0x160   :  { %v1763_v52 = vadd.f32 %v2861_v63, %v1319_v39  ;;  %v1322_v17 = vadd.f32 %v1321_v51, %v2812_v13 }
 0x161   :  { %v1829_v55 = vmax.f32 %v1765_v44, 0.0  ;;  %v1766_v56 = vadd.f32 %v2861_v63, %v1330_v47 }
 0x162   :  { %v1827_v60 = vmax.f32 %v1763_v52, 0.0  ;;  %v1764_v0 = vadd.f32 %v2861_v63, %v1322_v17 }
 0x163   :  { %1893 = vst [vmem:[%s3187_s3 + $0x30] sm:$0xff] %v1829_v55  ;;  %v1830_v9 = vmax.f32 %v1766_v56, 0.0 }
 0x164   :  { %1891 = vst [vmem:[%s3187_s3 + $0x20] sm:$0xff] %v1827_v60  ;;  %v1828_v21 = vmax.f32 %v1764_v0, 0.0  ;;  %v2902_v3 = vpop.f32.mrb[40].mxu0  ;;  %v2142_v4 = vpop.f32.mrb[40].mxu1 }
 0x165   :  { %1894 = vst [vmem:[%s3187_s3 + $0x38] sm:$0xff] %v1830_v9  ;;  %v1343_v13 = vadd.f32 %v2142_v4, %v2832_v33  ;;  %v1095_v7 = vpop.f32.mrb[41].mxu0  ;;  %v1334_v11 = vpop.f32.mrb[41].mxu1 }
 0x166   :  { %1892 = vst [vmem:[%s3187_s3 + $0x28] sm:$0xff] %v1828_v21  ;;  %v1335_v12 = vadd.f32 %v1334_v11, %v2824_v25  ;;  %v2912_v15 = vpop.f32.mrb[42].mxu0  ;;  %v2143_v16 = vpop.f32.mrb[42].mxu1 }
 0x167   :  { %v1769_v19 = vadd.f32 %v2861_v63, %v1343_v13  ;;  %v1346_v20 = vadd.f32 %v2143_v16, %v2836_v37  ;;  %v1098_v23 = vpop.f32.mrb[43].mxu0  ;;  %v1337_v24 = vpop.f32.mrb[43].mxu1 }
 0x168   :  { %v1767_v1 = vadd.f32 %v2861_v63, %v1335_v12  ;;  %v1338_v33 = vadd.f32 %v1337_v24, %v2828_v29 }
 0x169   :  { %v1833_v27 = vmax.f32 %v1769_v19, 0.0  ;;  %v1770_v28 = vadd.f32 %v2861_v63, %v1346_v20 }
 0x16a   :  { %v1831_v57 = vmax.f32 %v1767_v1, 0.0  ;;  %v1768_v5 = vadd.f32 %v2861_v63, %v1338_v33 }
 0x16b   :  { %1897 = vst [vmem:[%s3187_s3 + $0x50] sm:$0xff] %v1833_v27  ;;  %v1834_v25 = vmax.f32 %v1770_v28, 0.0 }
 0x16c   :  { %1895 = vst [vmem:[%s3187_s3 + $0x40] sm:$0xff] %v1831_v57  ;;  %v1832_v37 = vmax.f32 %v1768_v5, 0.0  ;;  %v1101_v32 = vpop.f32.mrb[44].mxu0  ;;  %v2146_v61 = vpop.f32.mrb[44].mxu1 }
 0x16d   :  { %1898 = vst [vmem:[%s3187_s3 + $0x58] sm:$0xff] %v1834_v25  ;;  %v1359_v29 = vadd.f32 %v2146_v61, %v2848_v49  ;;  %v1103_v35 = vpop.f32.mrb[45].mxu0  ;;  %v1350_v36 = vpop.f32.mrb[45].mxu1 }
 0x16e   :  { %1896 = vst [vmem:[%s3187_s3 + $0x48] sm:$0xff] %v1832_v37  ;;  %v1351_v39 = vadd.f32 %v1350_v36, %v2840_v41  ;;  %v1104_v43 = vpop.f32.mrb[46].mxu0  ;;  %v2147_v44 = vpop.f32.mrb[46].mxu1 }
 0x16f   :  { %v1773_v47 = vadd.f32 %v2861_v63, %v1359_v29  ;;  %v1362_v48 = vadd.f32 %v2147_v44, %v2852_v53  ;;  %v1106_v51 = vpop.f32.mrb[47].mxu0  ;;  %v1353_v52 = vpop.f32.mrb[47].mxu1 }
 0x170   :  { %v1771_v17 = vadd.f32 %v2861_v63, %v1351_v39  ;;  %v1354_v49 = vadd.f32 %v1353_v52, %v2844_v45 }
 0x171   :  { %v1837_v55 = vmax.f32 %v1773_v47, 0.0  ;;  %v1774_v56 = vadd.f32 %v2861_v63, %v1362_v48 }
 0x172   :  { %v1835_v60 = vmax.f32 %v1771_v17, 0.0  ;;  %v1772_v0 = vadd.f32 %v2861_v63, %v1354_v49 }
 0x173   :  { %1901 = vst [vmem:[%s3187_s3 + $0x70] sm:$0xff] %v1837_v55  ;;  %v1838_v41 = vmax.f32 %v1774_v56, 0.0 }
 0x174   :  { %1899 = vst [vmem:[%s3187_s3 + $0x60] sm:$0xff] %v1835_v60  ;;  %v1836_v53 = vmax.f32 %v1772_v0, 0.0  ;;  %v1109_v9 = vpop.f32.mrb[48].mxu0  ;;  %v2150_v21 = vpop.f32.mrb[48].mxu1 }
 0x175   :  { %1902 = vst [vmem:[%s3187_s3 + $0x78] sm:$0xff] %v1838_v41  ;;  %v1375_v45 = vadd.f32 %v2150_v21, %v2878_v31  ;;  %v1111_v4 = vpop.f32.mrb[49].mxu0  ;;  %v1366_v13 = vpop.f32.mrb[49].mxu1 }
 0x176   :  { %1900 = vst [vmem:[%s3187_s3 + $0x68] sm:$0xff] %v1836_v53  ;;  %v1367_v7 = vadd.f32 %v1366_v13, %v2856_v59  ;;  %v1112_v11 = vpop.f32.mrb[50].mxu0  ;;  %v2151_v12 = vpop.f32.mrb[50].mxu1 }
 0x177   :  { %v1777_v16 = vadd.f32 %v2861_v63, %v1375_v45  ;;  %v1378_v19 = vadd.f32 %v2151_v12, %v2888_v40  ;;  %v1114_v20 = vpop.f32.mrb[51].mxu0  ;;  %v1369_v23 = vpop.f32.mrb[51].mxu1 }
 0x178   :  { %v1775_v24 = vadd.f32 %v2861_v63, %v1367_v7  ;;  %v1370_v31 = vadd.f32 %v1369_v23, %v2864_v8 }
 0x179   :  { %v1841_v1 = vmax.f32 %v1777_v16, 0.0  ;;  %v1778_v33 = vadd.f32 %v2861_v63, %v1378_v19 }
 0x17a   :  { %v1839_v27 = vmax.f32 %v1775_v24, 0.0  ;;  %v1776_v28 = vadd.f32 %v2861_v63, %v1370_v31 }
 0x17b   :  { %1905 = vst [vmem:[%s3187_s3 + $0x90] sm:$0xff] %v1841_v1  ;;  %v1842_v59 = vmax.f32 %v1778_v33, 0.0 }
 0x17c   :  { %1903 = vst [vmem:[%s3187_s3 + $0x80] sm:$0xff] %v1839_v27  ;;  %v1840_v40 = vmax.f32 %v1776_v28, 0.0  ;;  %v1117_v57 = vpop.f32.mrb[52].mxu0  ;;  %v2154_v5 = vpop.f32.mrb[52].mxu1 }
 0x17d   :  { %1906 = vst [vmem:[%s3187_s3 + $0x98] sm:$0xff] %v1842_v59  ;;  %v1391_v8 = vadd.f32 %v2154_v5, %v1101_v32  ;;  %v1119_v25 = vpop.f32.mrb[53].mxu0  ;;  %v1382_v37 = vpop.f32.mrb[53].mxu1 }
 0x17e   :  { %1904 = vst [vmem:[%s3187_s3 + $0x88] sm:$0xff] %v1840_v40  ;;  %v1383_v61 = vadd.f32 %v1382_v37, %v2902_v3  ;;  %v1120_v29 = vpop.f32.mrb[54].mxu0  ;;  %v2155_v35 = vpop.f32.mrb[54].mxu1 }
 0x17f   :  { %v1781_v36 = vadd.f32 %v2861_v63, %v1391_v8  ;;  %v1394_v39 = vadd.f32 %v2155_v35, %v1104_v43  ;;  %v1122_v44 = vpop.f32.mrb[55].mxu0  ;;  %v1385_v47 = vpop.f32.mrb[55].mxu1 }
 0x180   :  { %v1779_v48 = vadd.f32 %v2861_v63, %v1383_v61  ;;  %v1386_v51 = vadd.f32 %v1385_v47, %v2912_v15 }
 0x181   :  { %v1845_v32 = vmax.f32 %v1781_v36, 0.0  ;;  %v1782_v52 = vadd.f32 %v2861_v63, %v1394_v39 }
 0x182   :  { %v1843_v17 = vmax.f32 %v1779_v48, 0.0  ;;  %v1780_v49 = vadd.f32 %v2861_v63, %v1386_v51 }
 0x183   :  { %1909 = vst [vmem:[%s3187_s3 + $0xb0] sm:$0xff] %v1845_v32  ;;  %v1846_v3 = vmax.f32 %v1782_v52, 0.0 }
 0x184   :  { %1907 = vst [vmem:[%s3187_s3 + $0xa0] sm:$0xff] %v1843_v17  ;;  %v1844_v43 = vmax.f32 %v1780_v49, 0.0  ;;  %v1125_v55 = vpop.f32.mrb[56].mxu0  ;;  %v2158_v56 = vpop.f32.mrb[56].mxu1 }
 0x185   :  { %1910 = vst [vmem:[%s3187_s3 + $0xb8] sm:$0xff] %v1846_v3  ;;  %v1407_v15 = vadd.f32 %v2158_v56, %v1117_v57  ;;  %v1127_v60 = vpop.f32.mrb[57].mxu0  ;;  %v1398_v0 = vpop.f32.mrb[57].mxu1 }
 0x186   :  { %1908 = vst [vmem:[%s3187_s3 + $0xa8] sm:$0xff] %v1844_v43  ;;  %v1399_v41 = vadd.f32 %v1398_v0, %v1109_v9  ;;  %v1128_v53 = vpop.f32.mrb[58].mxu0  ;;  %v2159_v21 = vpop.f32.mrb[58].mxu1 }
 0x187   :  { %v1785_v45 = vadd.f32 %v2861_v63, %v1407_v15  ;;  %v1410_v4 = vadd.f32 %v2159_v21, %v1120_v29  ;;  %v1130_v13 = vpop.f32.mrb[59].mxu0  ;;  %v1401_v7 = vpop.f32.mrb[59].mxu1 }
 0x188   :  { %v1783_v12 = vadd.f32 %v2861_v63, %v1399_v41  ;;  %v1402_v16 = vadd.f32 %v1401_v7, %v1112_v11 }
 0x189   :  { %v1849_v19 = vmax.f32 %v1785_v45, 0.0  ;;  %v1786_v20 = vadd.f32 %v2861_v63, %v1410_v4 }
 0x18a   :  { %v1847_v23 = vmax.f32 %v1783_v12, 0.0  ;;  %v1784_v24 = vadd.f32 %v2861_v63, %v1402_v16 }
 0x18b   :  { %1913 = vst [vmem:[%s3187_s3 + $0xd0] sm:$0xff] %v1849_v19  ;;  %v1850_v9 = vmax.f32 %v1786_v20, 0.0 }
 0x18c   :  { %1911 = vst [vmem:[%s3187_s3 + $0xc0] sm:$0xff] %v1847_v23  ;;  %v1848_v31 = vmax.f32 %v1784_v24, 0.0  ;;  %v1133_v1 = vpop.f32.mrb[60].mxu0  ;;  %v2162_v33 = vpop.f32.mrb[60].mxu1 }
 0x18d   :  { %1914 = vst [vmem:[%s3187_s3 + $0xd8] sm:$0xff] %v1850_v9  ;;  %v1423_v11 = vadd.f32 %v2162_v33, %v1133_v1  ;;  %v1135_v27 = vpop.f32.mrb[61].mxu0  ;;  %v1414_v28 = vpop.f32.mrb[61].mxu1 }
 0x18e   :  { %1912 = vst [vmem:[%s3187_s3 + $0xc8] sm:$0xff] %v1848_v31  ;;  %v1415_v59 = vadd.f32 %v1414_v28, %v1125_v55  ;;  %v1136_v40 = vpop.f32.mrb[62].mxu0  ;;  %v2163_v57 = vpop.f32.mrb[62].mxu1 }
 0x18f   :  { %v1789_v5 = vadd.f32 %v2861_v63, %v1423_v11  ;;  %v1426_v8 = vadd.f32 %v2163_v57, %v1136_v40  ;;  %v1138_v25 = vpop.f32.mrb[63].mxu0  ;;  %v1417_v37 = vpop.f32.mrb[63].mxu1 }
 0x190   :  { %v1787_v61 = vadd.f32 %v2861_v63, %v1415_v59  ;;  %v1418_v29 = vadd.f32 %v1417_v37, %v1128_v53 }
 0x191   :  { %v1853_v35 = vmax.f32 %v1789_v5, 0.0  ;;  %v1790_v36 = vadd.f32 %v2861_v63, %v1426_v8 }
 0x192   :  { %v1851_v39 = vmax.f32 %v1787_v61, 0.0  ;;  %v1788_v44 = vadd.f32 %v2861_v63, %v1418_v29 }
 0x193   :  { %1917 = vst [vmem:[%s3187_s3 + $0xf0] sm:$0xff] %v1853_v35  ;;  %v1854_v47 = vmax.f32 %v1790_v36, 0.0 }
 0x194   :  { %1915 = vst [vmem:[%s3187_s3 + $0xe0] sm:$0xff] %v1851_v39  ;;  %v1852_v48 = vmax.f32 %v1788_v44, 0.0  ;;  %v1141_v51 = vpop.f32.mrb[64].mxu0  ;;  %v2166_v32 = vpop.f32.mrb[64].mxu1 }
 0x195   :  { %1918 = vst [vmem:[%s3187_s3 + $0xf8] sm:$0xff] %v1854_v47  ;;  %v1143_v52 = vpop.f32.mrb[65].mxu0  ;;  %v1430_v17 = vpop.f32.mrb[65].mxu1 }
 0x196   :  { %1916 = vst [vmem:[%s3187_s3 + $0xe8] sm:$0xff] %v1852_v48  ;;  %v1431_v49 = vadd.f32 %v1430_v17, %v1141_v51  ;;  %v1144_v3 = vpop.f32.mrb[66].mxu0  ;;  %v2167_v43 = vpop.f32.mrb[66].mxu1 }
 0x197   :  { %v1146_v55 = vpop.f32.mrb[67].mxu0  ;;  %v1433_v56 = vpop.f32.mrb[67].mxu1 }
 0x198   :  { %v1791_v15 = vadd.f32 %v2861_v63, %v1431_v49  ;;  %v1434_v60 = vadd.f32 %v1433_v56, %v1144_v3 }
 0x19a   :  { %v1855_v0 = vmax.f32 %v1791_v15, 0.0  ;;  %v1792_v41 = vadd.f32 %v2861_v63, %v1434_v60 }
 0x19c   :  { %1919 = vst [vmem:[%s3187_s3 + $0x100] sm:$0xff] %v1855_v0  ;;  %v1856_v53 = vmax.f32 %v1792_v41, 0.0  ;;  %v1149_v21 = vpop.f32.mrb[68].mxu0  ;;  %v2170_v45 = vpop.f32.mrb[68].mxu1 }
 0x19d   :  { %v1439_v4 = vadd.f32 %v2166_v32, %v1149_v21  ;;  %v1151_v13 = vpop.f32.mrb[69].mxu0  ;;  %v1446_v7 = vpop.f32.mrb[69].mxu1 }
 0x19e   :  { %1920 = vst [vmem:[%s3187_s3 + $0x108] sm:$0xff] %v1856_v53  ;;  %v1152_v12 = vpop.f32.mrb[70].mxu0  ;;  %v2171_v16 = vpop.f32.mrb[70].mxu1 }
 0x19f   :  { %v1793_v19 = vadd.f32 %v2861_v63, %v1439_v4  ;;  %v1442_v20 = vadd.f32 %v2167_v43, %v1152_v12  ;;  %v1154_v23 = vpop.f32.mrb[71].mxu0  ;;  %v1449_v24 = vpop.f32.mrb[71].mxu1 }
 0x1a1   :  { %v1857_v9 = vmax.f32 %v1793_v19, 0.0  ;;  %v1794_v31 = vadd.f32 %v2861_v63, %v1442_v20 }
 0x1a3   :  { %1921 = vst [vmem:[%s3187_s3 + $0x110] sm:$0xff] %v1857_v9  ;;  %v1858_v1 = vmax.f32 %v1794_v31, 0.0 }
 0x1a4   :  { %v1157_v33 = vpop.f32.mrb[72].mxu0  ;;  %v3035_v11 = vpop.f32.mrb[72].mxu1 }
 0x1a5   :  { %1922 = vst [vmem:[%s3187_s3 + $0x118] sm:$0xff] %v1858_v1  ;;  %v1447_v27 = vadd.f32 %v1446_v7, %v1157_v33  ;;  %v1159_v28 = vpop.f32.mrb[73].mxu0  ;;  %v1462_v59 = vpop.f32.mrb[73].mxu1 }
 0x1a6   :  { %v1160_v40 = vpop.f32.mrb[74].mxu0  ;;  %v3040_v57 = vpop.f32.mrb[74].mxu1 }
 0x1a7   :  { %v1795_v5 = vadd.f32 %v2861_v63, %v1447_v27  ;;  %v1450_v8 = vadd.f32 %v1449_v24, %v1160_v40  ;;  %v1162_v25 = vpop.f32.mrb[75].mxu0  ;;  %v1465_v37 = vpop.f32.mrb[75].mxu1 }
 0x1a9   :  { %v1859_v61 = vmax.f32 %v1795_v5, 0.0  ;;  %v1796_v29 = vadd.f32 %v2861_v63, %v1450_v8 }
 0x1ab   :  { %1923 = vst [vmem:[%s3187_s3 + $0x120] sm:$0xff] %v1859_v61  ;;  %v1860_v35 = vmax.f32 %v1796_v29, 0.0 }
 0x1ac   :  { %v1165_v36 = vpop.f32.mrb[76].mxu0  ;;  %v3047_v39 = vpop.f32.mrb[76].mxu1 }
 0x1ad   :  { %1924 = vst [vmem:[%s3187_s3 + $0x128] sm:$0xff] %v1860_v35  ;;  %v1455_v44 = vadd.f32 %v2170_v45, %v1165_v36  ;;  %v1167_v47 = vpop.f32.mrb[77].mxu0  ;;  %v3052_v48 = vpop.f32.mrb[77].mxu1 }
 0x1ae   :  { %v1168_v51 = vpop.f32.mrb[78].mxu0  ;;  %v3054_v32 = vpop.f32.mrb[78].mxu1 }
 0x1af   :  { %v1797_v52 = vadd.f32 %v2861_v63, %v1455_v44  ;;  %v1458_v17 = vadd.f32 %v2171_v16, %v1168_v51  ;;  %v1170_v49 = vpop.f32.mrb[79].mxu0  ;;  %v3057_v3 = vpop.f32.mrb[79].mxu1 }
 0x1b1   :  { %v1861_v43 = vmax.f32 %v1797_v52, 0.0  ;;  %v1798_v55 = vadd.f32 %v2861_v63, %v1458_v17 }
 0x1b3   :  { %1925 = vst [vmem:[%s3187_s3 + $0x130] sm:$0xff] %v1861_v43  ;;  %v1862_v56 = vmax.f32 %v1798_v55, 0.0 }
 0x1b4   :  { %v1173_v15 = vpop.f32.mrb[80].mxu0  ;;  %v2182_v60 = vpop.f32.mrb[80].mxu1 }
 0x1b5   :  { %1926 = vst [vmem:[%s3187_s3 + $0x138] sm:$0xff] %v1862_v56  ;;  %v1463_v0 = vadd.f32 %v1462_v59, %v1173_v15  ;;  %v1503_v41 = vadd.f32 %v2182_v60, %v2802_v2  ;;  %v1175_v53 = vpop.f32.mrb[81].mxu0  ;;  %v1494_v21 = vpop.f32.mrb[81].mxu1 }
 0x1b6   :  { %v1495_v45 = vadd.f32 %v1494_v21, %v2796_v58  ;;  %v1176_v4 = vpop.f32.mrb[82].mxu0  ;;  %v2183_v13 = vpop.f32.mrb[82].mxu1 }
 0x1b7   :  { %v1799_v7 = vadd.f32 %v2861_v63, %v1463_v0  ;;  %v1809_v12 = vadd.f32 %v2861_v63, %v1503_v41  ;;  %v1466_v16 = vadd.f32 %v1465_v37, %v1176_v4  ;;  %v1506_v19 = vadd.f32 %v2183_v13, %v2806_v6  ;;  %v1178_v20 = vpop.f32.mrb[83].mxu0  ;;  %v1497_v23 = vpop.f32.mrb[83].mxu1 }
 0x1b8   :  { %v1807_v24 = vadd.f32 %v2861_v63, %v1495_v45  ;;  %v1498_v9 = vadd.f32 %v1497_v23, %v2800_v62 }
 0x1b9   :  { %v1863_v2 = vmax.f32 %v1799_v7, 0.0  ;;  %v1873_v31 = vmax.f32 %v1809_v12, 0.0  ;;  %v1800_v1 = vadd.f32 %v2861_v63, %v1466_v16  ;;  %v1810_v58 = vadd.f32 %v2861_v63, %v1506_v19 }
 0x1ba   :  { %v1871_v33 = vmax.f32 %v1807_v24, 0.0  ;;  %v1808_v27 = vadd.f32 %v2861_v63, %v1498_v9 }
 0x1bb   :  { %1927 = vst [vmem:[%s3187_s3 + $0x140] sm:$0xff] %v1863_v2  ;;  %1937 = vst [vmem:[%s3187_s3 + $0x190] sm:$0xff] %v1873_v31  ;;  %v1864_v6 = vmax.f32 %v1800_v1, 0.0  ;;  %v1874_v28 = vmax.f32 %v1810_v58, 0.0 }
 0x1bc   :  { %1935 = vst [vmem:[%s3187_s3 + $0x180] sm:$0xff] %v1871_v33  ;;  %v1872_v62 = vmax.f32 %v1808_v27, 0.0  ;;  %v1181_v59 = vpop.f32.mrb[84].mxu0  ;;  %v2186_v40 = vpop.f32.mrb[84].mxu1 }
 0x1bd   :  { %1928 = vst [vmem:[%s3187_s3 + $0x148] sm:$0xff] %v1864_v6  ;;  %1938 = vst [vmem:[%s3187_s3 + $0x198] sm:$0xff] %v1874_v28  ;;  %v1471_v5 = vadd.f32 %v3035_v11, %v1181_v59  ;;  %v1519_v8 = vadd.f32 %v2186_v40, %v2818_v18  ;;  %v1183_v25 = vpop.f32.mrb[85].mxu0  ;;  %v1510_v37 = vpop.f32.mrb[85].mxu1 }
 0x1be   :  { %1936 = vst [vmem:[%s3187_s3 + $0x188] sm:$0xff] %v1872_v62  ;;  %v1511_v61 = vadd.f32 %v1510_v37, %v2810_v10  ;;  %v1184_v29 = vpop.f32.mrb[86].mxu0  ;;  %v2187_v35 = vpop.f32.mrb[86].mxu1 }
 0x1bf   :  { %v1801_v36 = vadd.f32 %v2861_v63, %v1471_v5  ;;  %v1813_v44 = vadd.f32 %v2861_v63, %v1519_v8  ;;  %v1474_v47 = vadd.f32 %v3040_v57, %v1184_v29  ;;  %v1522_v11 = vadd.f32 %v2187_v35, %v2822_v22  ;;  %v1186_v51 = vpop.f32.mrb[87].mxu0  ;;  %v1513_v18 = vpop.f32.mrb[87].mxu1 }
 0x1c0   :  { %v1811_v52 = vadd.f32 %v2861_v63, %v1511_v61  ;;  %v1514_v17 = vadd.f32 %v1513_v18, %v2814_v14 }
 0x1c1   :  { %v1865_v49 = vmax.f32 %v1801_v36, 0.0  ;;  %v1877_v43 = vmax.f32 %v1813_v44, 0.0  ;;  %v1802_v10 = vadd.f32 %v2861_v63, %v1474_v47  ;;  %v1814_v55 = vadd.f32 %v2861_v63, %v1522_v11 }
 0x1c2   :  { %v1875_v56 = vmax.f32 %v1811_v52, 0.0  ;;  %v1812_v15 = vadd.f32 %v2861_v63, %v1514_v17 }
 0x1c3   :  { %1929 = vst [vmem:[%s3187_s3 + $0x150] sm:$0xff] %v1865_v49  ;;  %1941 = vst [vmem:[%s3187_s3 + $0x1b0] sm:$0xff] %v1877_v43  ;;  %v1866_v22 = vmax.f32 %v1802_v10, 0.0  ;;  %v1878_v57 = vmax.f32 %v1814_v55, 0.0 }
 0x1c4   :  { %1939 = vst [vmem:[%s3187_s3 + $0x1a0] sm:$0xff] %v1875_v56  ;;  %v1876_v14 = vmax.f32 %v1812_v15, 0.0  ;;  %v1189_v60 = vpop.f32.mrb[88].mxu0  ;;  %v2190_v0 = vpop.f32.mrb[88].mxu1 }
 0x1c5   :  { %1930 = vst [vmem:[%s3187_s3 + $0x158] sm:$0xff] %v1866_v22  ;;  %1942 = vst [vmem:[%s3187_s3 + $0x1b8] sm:$0xff] %v1878_v57  ;;  %v1479_v41 = vadd.f32 %v3052_v48, %v1189_v60  ;;  %v1535_v53 = vadd.f32 %v2190_v0, %v2834_v34  ;;  %v1191_v21 = vpop.f32.mrb[89].mxu0  ;;  %v1526_v45 = vpop.f32.mrb[89].mxu1 }
 0x1c6   :  { %1940 = vst [vmem:[%s3187_s3 + $0x1a8] sm:$0xff] %v1876_v14  ;;  %v1527_v4 = vadd.f32 %v1526_v45, %v2826_v26  ;;  %v1192_v13 = vpop.f32.mrb[90].mxu0  ;;  %v2191_v7 = vpop.f32.mrb[90].mxu1 }
 0x1c7   :  { %v1803_v12 = vadd.f32 %v2861_v63, %v1479_v41  ;;  %v1817_v16 = vadd.f32 %v2861_v63, %v1535_v53  ;;  %v1482_v19 = vadd.f32 %v3057_v3, %v1192_v13  ;;  %v1538_v48 = vadd.f32 %v2191_v7, %v2838_v38  ;;  %v1194_v20 = vpop.f32.mrb[91].mxu0  ;;  %v1529_v34 = vpop.f32.mrb[91].mxu1 }
 0x1c8   :  { %v1815_v23 = vadd.f32 %v2861_v63, %v1527_v4  ;;  %v1530_v24 = vadd.f32 %v1529_v34, %v2830_v30 }
 0x1c9   :  { %v1867_v9 = vmax.f32 %v1803_v12, 0.0  ;;  %v1881_v2 = vmax.f32 %v1817_v16, 0.0  ;;  %v1804_v26 = vadd.f32 %v2861_v63, %v1482_v19  ;;  %v1818_v31 = vadd.f32 %v2861_v63, %v1538_v48 }
 0x1ca   :  { %v1879_v1 = vmax.f32 %v1815_v23, 0.0  ;;  %v1816_v58 = vadd.f32 %v2861_v63, %v1530_v24 }
 0x1cb   :  { %1931 = vst [vmem:[%s3187_s3 + $0x160] sm:$0xff] %v1867_v9  ;;  %1945 = vst [vmem:[%s3187_s3 + $0x1d0] sm:$0xff] %v1881_v2  ;;  %v1868_v38 = vmax.f32 %v1804_v26, 0.0  ;;  %v1882_v3 = vmax.f32 %v1818_v31, 0.0 }
 0x1cc   :  { %1943 = vst [vmem:[%s3187_s3 + $0x1c0] sm:$0xff] %v1879_v1  ;;  %v1880_v30 = vmax.f32 %v1816_v58, 0.0  ;;  %v1197_v33 = vpop.f32.mrb[92].mxu0  ;;  %v2194_v27 = vpop.f32.mrb[92].mxu1 }
 0x1cd   :  { %1932 = vst [vmem:[%s3187_s3 + $0x168] sm:$0xff] %v1868_v38  ;;  %1946 = vst [vmem:[%s3187_s3 + $0x1d8] sm:$0xff] %v1882_v3  ;;  %v1487_v6 = vadd.f32 %v3047_v39, %v1197_v33  ;;  %v1551_v28 = vadd.f32 %v2194_v27, %v2850_v50  ;;  %v1199_v62 = vpop.f32.mrb[93].mxu0  ;;  %v1542_v59 = vpop.f32.mrb[93].mxu1 }
 0x1ce   :  { %1944 = vst [vmem:[%s3187_s3 + $0x1c8] sm:$0xff] %v1880_v30  ;;  %v1543_v40 = vadd.f32 %v1542_v59, %v2842_v42  ;;  %v1200_v5 = vpop.f32.mrb[94].mxu0  ;;  %v2195_v8 = vpop.f32.mrb[94].mxu1 }
 0x1cf   :  { %v1805_v25 = vadd.f32 %v2861_v63, %v1487_v6  ;;  %v1821_v37 = vadd.f32 %v2861_v63, %v1551_v28  ;;  %v1490_v61 = vadd.f32 %v3054_v32, %v1200_v5  ;;  %v1554_v39 = vadd.f32 %v2195_v8, %v2854_v54  ;;  %v1202_v29 = vpop.f32.mrb[95].mxu0  ;;  %v1545_v50 = vpop.f32.mrb[95].mxu1 }
 0x1d0   :  { %v1819_v35 = vadd.f32 %v2861_v63, %v1543_v40  ;;  %v1546_v36 = vadd.f32 %v1545_v50, %v2846_v46 }
 0x1d1   :  { %v1869_v44 = vmax.f32 %v1805_v25, 0.0  ;;  %v1885_v47 = vmax.f32 %v1821_v37, 0.0  ;;  %v1806_v42 = vadd.f32 %v2861_v63, %v1490_v61  ;;  %v1822_v11 = vadd.f32 %v2861_v63, %v1554_v39 }
 0x1d2   :  { %v1883_v51 = vmax.f32 %v1819_v35, 0.0  ;;  %v1820_v18 = vadd.f32 %v2861_v63, %v1546_v36 }
 0x1d3   :  { %1933 = vst [vmem:[%s3187_s3 + $0x170] sm:$0xff] %v1869_v44  ;;  %1949 = vst [vmem:[%s3187_s3 + $0x1f0] sm:$0xff] %v1885_v47  ;;  %v1870_v54 = vmax.f32 %v1806_v42, 0.0  ;;  %v1886_v32 = vmax.f32 %v1822_v11, 0.0 }
 0x1d4   :  { %1947 = vst [vmem:[%s3187_s3 + $0x1e0] sm:$0xff] %v1883_v51  ;;  %v1884_v46 = vmax.f32 %v1820_v18, 0.0 }
 0x1d5   :  { %1934 = vst [vmem:[%s3187_s3 + $0x178] sm:$0xff] %v1870_v54  ;;  %1950 = vst [vmem:[%s3187_s3 + $0x1f8] sm:$0xff] %v1886_v32 }
 0x1d6   :  { %1948 = vst [vmem:[%s3187_s3 + $0x1e8] sm:$0xff] %v1884_v46 }

</bundles_post_ra>
